<compile_context>
chip_gen: v7x
topology: tpu7x:2x2x1
jax: 0.10.0
libtpu: 0.0.40
codegen_flags: <defaults>
</compile_context>

<pallas_src>
import math

import jax
import jax.numpy as jnp
from jax.experimental import pallas as pl
from jax.experimental.pallas import tpu as pltpu

_TARGET_BLOCK_BYTES = 2 * 1024 * 1024   # ~2 MiB/block -> 8 MiB double-buffered (in+out)
_FALLBACK_LANES = 512                   # lane-dense slab width for ragged inputs
_INV_SQRT2 = 0.7071067811865476


def _round_up(v, m):
    return ((v + m - 1) // m) * m


def _sublane(dtype):
    # f32 -> 8, bf16/f16 -> 16, int8/fp8 -> 32 rows per sublane tile.
    return max(8, 32 // jnp.dtype(dtype).itemsize)


def _gelu_kernel(x_ref, o_ref):
    x = x_ref[...].astype(jnp.float32)
    ax = jnp.abs(x)
    az = ax * _INV_SQRT2
    # Abramowitz & Stegun 7.1.26:  erf(|z|) = 1 - poly(t) * exp(-z^2),
    # with t = 1 / (1 + p*|z|).  Reciprocal on the EUP + one Newton step.
    d = 1.0 + 0.3275911 * az
    r = pl.reciprocal(d, approx=True)
    r = r * (2.0 - d * r)
    poly = ((((1.061405429 * r - 1.453152027) * r + 1.421413741) * r
             - 0.284496736) * r + 0.254829592) * r
    e = jnp.exp(-az * az)
    # sign(x) == sign(z)  =>  x * erf(z) = |x| * (1 - poly * e); no select needed.
    y = 0.5 * (x + ax - ax * poly * e)
    o_ref[...] = y.astype(o_ref.dtype)


def _choose_block_rows(rows, lanes, itemsize, sublane):
    """Pick a sublane-aligned block row count near a ~2 MiB byte budget."""
    per_row_bytes = lanes * itemsize
    br = max(1, _TARGET_BLOCK_BYTES // per_row_bytes)
    br = max(sublane, (br // sublane) * sublane)
    if rows <= sublane:
        return rows                               # one block spanning the full dim
    if br >= rows:
        # Whole tensor fits in one block: split in two so the "parallel" grid
        # axis can keep both v7x TensorCores busy.
        return _round_up(-(-rows // 2), sublane)
    # Rebalance so the tail block is not nearly empty (avoids dead HBM traffic).
    nsteps = -(-rows // br)
    return _round_up(-(-rows // nsteps), sublane)


def _run_2d(x2d, block_rows, lanes):
    rows = x2d.shape[0]
    return pl.pallas_call(
        _gelu_kernel,
        out_shape=jax.ShapeDtypeStruct(x2d.shape, x2d.dtype),
        grid_spec=pltpu.PrefetchScalarGridSpec(
            num_scalar_prefetch=0,
            grid=(pl.cdiv(rows, block_rows),),
            in_specs=[pl.BlockSpec((block_rows, lanes), lambda i: (i, 0))],
            out_specs=pl.BlockSpec((block_rows, lanes), lambda i: (i, 0)),
        ),
        compiler_params=pltpu.CompilerParams(
            dimension_semantics=("parallel",)),
    )(x2d)


@jax.jit
def pallas_gelu(x):
    """Exact (erf-flavor) GELU of an arbitrarily shaped array."""
    orig_shape = x.shape
    itemsize = jnp.dtype(x.dtype).itemsize
    sublane = _sublane(x.dtype)

    if x.ndim >= 2 and x.shape[-1] % 128 == 0:
        # Fast path: lane-dense last dim, collapse leading dims for free.
        lanes = x.shape[-1]
        rows = max(1, math.prod(x.shape[:-1]))
        x2d = x.reshape(rows, lanes)
        block_rows = _choose_block_rows(rows, lanes, itemsize, sublane)
        out2d = _run_2d(x2d, block_rows, lanes)
        return out2d.reshape(orig_shape)

    # Fallback for ragged sizes: flatten + pad to a (rows, 512) slab.
    flat = x.reshape(-1)
    n = flat.shape[0]
    lanes = _FALLBACK_LANES
    rows = max(1, -(-n // lanes))
    flat = jnp.pad(flat, (0, rows * lanes - n))
    x2d = flat.reshape(rows, lanes)
    block_rows = _choose_block_rows(rows, lanes, itemsize, sublane)
    out2d = _run_2d(x2d, block_rows, lanes)
    return out2d.reshape(-1)[:n].reshape(orig_shape)


def _reference_gelu(x):
    # Same semantics as torch.nn.functional.gelu(x) (approximate='none').
    xf = x.astype(jnp.float32)
    return (0.5 * xf * (1.0 + jax.lax.erf(xf * _INV_SQRT2))).astype(x.dtype)


if __name__ == "__main__":
    key = jax.random.PRNGKey(0)
    k1, k2, k3 = jax.random.split(key, 3)

    # BERT-style activation input (fast path, lane-dense last dim).
    x = jax.random.normal(k1, (2, 8, 512), jnp.float32) * 2.0
    # Awkward shape exercising the flatten/pad fallback path.
    x_small = jax.random.normal(k2, (2, 4, 16, 16), jnp.float32) * 3.0
    # bf16 input exercising the dtype-aware sublane rounding.
    x_bf16 = (jax.random.normal(k3, (2, 8, 256), jnp.float32) * 2.0).astype(jnp.bfloat16)

    y = jax.block_until_ready(pallas_gelu(x))
    y_small = jax.block_until_ready(pallas_gelu(x_small))
    y_bf16 = jax.block_until_ready(pallas_gelu(x_bf16))

    assert y.shape == x.shape and y.dtype == x.dtype, (y.shape, y.dtype)
    assert y_small.shape == x_small.shape, y_small.shape
    assert y_bf16.shape == x_bf16.shape and y_bf16.dtype == x_bf16.dtype

    ref = _reference_gelu(x)
    ref_small = _reference_gelu(x_small)
    ref_bf16 = _reference_gelu(x_bf16)

    if not jnp.allclose(y, ref, atol=1e-5, rtol=1e-5):
        raise AssertionError("Pallas GELU mismatch vs. exact-erf reference (f32)")
    if not jnp.allclose(y_small, ref_small, atol=1e-5, rtol=1e-5):
        raise AssertionError("Pallas GELU mismatch vs. exact-erf reference (small)")
    if not jnp.allclose(y_bf16.astype(jnp.float32), ref_bf16.astype(jnp.float32),
                        atol=3e-2, rtol=3e-2):
        raise AssertionError("Pallas GELU mismatch vs. exact-erf reference (bf16)")

    print("KERNEL_OK")
</pallas_src>

<mosaic_0001>
module attributes {stable_mosaic.version = 11 : i64} {
  func.func @_gelu_kernel(%arg0: i32, %arg1: memref<8x512xf32, #tpu.memory_space<vmem>>, %arg2: memref<8x512xf32, #tpu.memory_space<vmem>>) attributes {dimension_semantics = [#tpu.dimension_semantics<parallel>], iteration_bounds = array<i64: 2>, scalar_prefetch = 0 : i64, scratch_operands = 0 : i64, tpu.core_type = #tpu.core_type<tc>, window_params = [{transform_indices = @transform_0, window_bounds = array<i64: 8, 512>}, {transform_indices = @transform_1, window_bounds = array<i64: 8, 512>}]} {
    %c0 = arith.constant 0 : index
    %c0_0 = arith.constant 0 : index
    %0 = vector.load %arg1[%c0, %c0_0] : memref<8x512xf32, #tpu.memory_space<vmem>>, vector<8x512xf32>
    %1 = math.absf %0 : vector<8x512xf32>
    %cst = arith.constant 0.707106769 : f32
    %2 = vector.broadcast %cst : f32 to vector<8x512xf32>
    %3 = arith.mulf %1, %2 : vector<8x512xf32>
    %cst_1 = arith.constant 0.327591091 : f32
    %4 = vector.broadcast %cst_1 : f32 to vector<8x512xf32>
    %5 = arith.mulf %4, %3 : vector<8x512xf32>
    %cst_2 = arith.constant 1.000000e+00 : f32
    %6 = vector.broadcast %cst_2 : f32 to vector<8x512xf32>
    %7 = arith.addf %6, %5 : vector<8x512xf32>
    %8 = tpu.reciprocal %7 {approx = true} : vector<8x512xf32> -> vector<8x512xf32>
    %9 = arith.mulf %7, %8 : vector<8x512xf32>
    %cst_3 = arith.constant 2.000000e+00 : f32
    %10 = vector.broadcast %cst_3 : f32 to vector<8x512xf32>
    %11 = arith.subf %10, %9 : vector<8x512xf32>
    %12 = arith.mulf %8, %11 : vector<8x512xf32>
    %cst_4 = arith.constant 1.06140542 : f32
    %13 = vector.broadcast %cst_4 : f32 to vector<8x512xf32>
    %14 = arith.mulf %13, %12 : vector<8x512xf32>
    %cst_5 = arith.constant 1.45315206 : f32
    %15 = vector.broadcast %cst_5 : f32 to vector<8x512xf32>
    %16 = arith.subf %14, %15 : vector<8x512xf32>
    %17 = arith.mulf %16, %12 : vector<8x512xf32>
    %cst_6 = arith.constant 1.42141378 : f32
    %18 = vector.broadcast %cst_6 : f32 to vector<8x512xf32>
    %19 = arith.addf %17, %18 : vector<8x512xf32>
    %20 = arith.mulf %19, %12 : vector<8x512xf32>
    %cst_7 = arith.constant 0.284496725 : f32
    %21 = vector.broadcast %cst_7 : f32 to vector<8x512xf32>
    %22 = arith.subf %20, %21 : vector<8x512xf32>
    %23 = arith.mulf %22, %12 : vector<8x512xf32>
    %cst_8 = arith.constant 0.254829586 : f32
    %24 = vector.broadcast %cst_8 : f32 to vector<8x512xf32>
    %25 = arith.addf %23, %24 : vector<8x512xf32>
    %26 = arith.mulf %25, %12 : vector<8x512xf32>
    %cst_9 = arith.constant 0.000000e+00 : f32
    %27 = vector.broadcast %cst_9 : f32 to vector<8x512xf32>
    %28 = arith.subf %27, %3 : vector<8x512xf32>
    %29 = arith.mulf %28, %3 : vector<8x512xf32>
    %30 = math.exp %29 : vector<8x512xf32>
    %31 = arith.addf %0, %1 : vector<8x512xf32>
    %32 = arith.mulf %1, %26 : vector<8x512xf32>
    %33 = arith.mulf %32, %30 : vector<8x512xf32>
    %34 = arith.subf %31, %33 : vector<8x512xf32>
    %cst_10 = arith.constant 5.000000e-01 : f32
    %35 = vector.broadcast %cst_10 : f32 to vector<8x512xf32>
    %36 = arith.mulf %35, %34 : vector<8x512xf32>
    %c0_11 = arith.constant 0 : index
    %c0_12 = arith.constant 0 : index
    %37 = vector.load %arg2[%c0_11, %c0_12] : memref<8x512xf32, #tpu.memory_space<vmem>>, vector<8x512xf32>
    tpu.vector_store %arg2[%c0_11, %c0_12], %36 {strides = array<i32>} : memref<8x512xf32, #tpu.memory_space<vmem>>, vector<8x512xf32>,
    return
  }
  func.func @transform_0(%arg0: i32) -> (i32, i32) {
    %c0_i32 = arith.constant 0 : i32
    %c0_i32_0 = arith.constant 0 : i32
    return %arg0, %c0_i32 : i32, i32
  }
  func.func @transform_1(%arg0: i32) -> (i32, i32) {
    %c0_i32 = arith.constant 0 : i32
    %c0_i32_0 = arith.constant 0 : i32
    return %arg0, %c0_i32 : i32, i32
  }
}

</mosaic_0001>

<bundles_post_ra>
// kernel: pallas_gelu.1
= control target key start
LH: loop header
LB: loop body
LE: loop exit
PB: predicated region body
PF: predicated region fallthrough
CT: control target
= control target key end

     0   :  { %6 = vsyncpa [#allocation3], 0  ;;  %s727_s0 = inlined_call_operand.hbm [shape: f32[16,512], index: 0, kind: input, shape index: {}]   ;;  %s728_s1 = inlined_call_operand.hbm [shape: f32[16,512], index: 1, kind: output, shape index: {}]  }
   0x1   :  { %8 = vsyncpa [#allocation3 + $0x1], 0 }
   0x2   :  { %9 = vsyncpa [#allocation4], 0 }
   0x3   :  { %11 = vsyncpa [#allocation4 + $0x1], 0  ;;  %s526_s6 = smov 0   ;;  %s528_s7 = smov 0  }
   0x4   :  { %s530_s8 = smov 0   ;;  %s532_s9 = smov 0  }
   0x5 LB: > { %s547_s10 = sadd.s32 4294967295, %s512_s9   ;;  %s330_s11 = sadd.s32 4294967294, %s512_s9   ;;  %s512_s9 = sphi %s532_s9, %s743_s9   ;;  %s508_s8 = sphi %s530_s8, %s742_s8   ;;  %s504_s7 = sphi %s528_s7, %s741_s7   ;;  %s500_s6 = sphi %s526_s6, %s740_s6  }
   0x6   : > { %s551_s12 = sadd.s32 1, %s512_s9   ;;  %s24_s13 = sadd.s32 1, %s508_s8 }
   0x7   : > { %s21_s14 = ssub.s32 %s512_s9, %s551_s12  ;;  %p31_p0 = scmp.ne.s32.totalorder %s508_s8, %s504_s7 }
   0x8   : > { %p22_p1 = scmp.eq.s32.totalorder %s21_s14, 0  ;;  %p32_p2 = scmp.eq.s32.totalorder %s512_s9, 0 }
   0x9   : > { %p37_p3 = scmp.ne.s32.totalorder %s504_s7, %s500_s6  ;;  %p38_p4 = scmp.eq.s32.totalorder %s547_s10, 0 }
   0xa   : > { %s563_s15 = scalar_select %p22_p1, %s508_s8, %s24_s13  }
   0xb   : > { %p565_p5 = por %p32_p2, %p31_p0  ;;  %p569_p6 = por %p38_p4, %p37_p3 }
   0xc   : > { %p61_p7 = scmp.eq.s32.totalorder %s547_s10, 1  ;;  %p67_p8 = scmp.eq.s32.totalorder %s330_s11, 1 }
   0xd   : > { %p366_p10 = scmp.lt.s32.totalorder %s512_s9, 2  ;;  %s87_s20 = sand.u32 1, %s508_s8  }
   0xe   : > { %p576_p11 = por %p61_p7, %p31_p0  ;;  %p580_p12 = por %p67_p8, %p37_p3 }
   0xf   : > { %s352_s21 = sshll.u32 %s512_s9, 9  ;;  %s333_s22 = sshll.u32 %s87_s20, 5 }
  0x10   : > { %s732_s18 = scalar_select %p576_p11, 1, 0 }
  0x11   : > { %s733_s19 = scalar_select %p580_p12, 1, 0 }
  0x12   : > { %s589_s25 = scalar_lea.hbm %s727_s0, %s352_s21  ;;  %s91_s26 = scalar_lea.vmem [#allocation2], %s333_s22 }
  0x13   : > { %s99_s27 = sshll.u32 %s91_s26, 4  ;;  %p593_p13 = pnand %p366_p10, %p565_p5  ;;  %s597_s27 = int_to_ptr.vmem [resolvable:$true] %s99_s27 }
  0x14   : > { %s88_s29 = scalar_lea.sflag [#allocation3], %s87_s20  ;;  %s416_s30 = scalar_lea.hbm %s589_s25, 512 }
  0x15   : > { %p417_p2 = scmp.ne.s32.totalorder %s589_s25, %s416_s30  ;;  %p418_p3 = pneg %p593_p13 }
  0x16   : > { %s421_s4 = scalar_lea.hbm %s727_s0, 1024  ;;  %p422_p5 = scmp.lt.u32.totalorder %s589_s25, %s727_s0 }
  0x17   : > { %p419_p4 = pnand %p418_p3, %p417_p2  ;;  %p423_p8 = scmp.lt.u32.totalorder %s421_s4, %s416_s30 }
  0x18   : > { %p425_p9 = scmp.lt.u32.totalorder %s416_s30, %s589_s25 }
  0x19   : > { %p420_p7 = pneg %p419_p4  ;;  %p424_p10 = por %p423_p8, %p422_p5 }
  0x1b   : > { %p426_p0 = por %p425_p9, %p424_p10 }
  0x1d   : > { %p427_p1 = pnand %p426_p0, %p420_p7 }
  0x1f   : > { %430 = shalt.err (!%p427_p1)
}
  0x20   : > { %s431_s13 = scalar_lea.vmem %s597_s27, 512  ;;  %s514_s14 = smov [#allocation2]  }
  0x21   : > { %p432_p2 = scmp.ne.s32.totalorder %s597_s27, %s431_s13  ;;  %s436_s16 = sshll.u32 %s514_s14, 4  ;;  %s437_s16 = int_to_ptr.vmem [resolvable:$false] %s436_s16 }
  0x22   : > { %s438_s20 = scalar_lea.vmem %s437_s16, 1024  ;;  %p439_p11 = scmp.lt.s32.totalorder %s597_s27, %s437_s16 }
  0x23   : > { %p434_p4 = pnand %p432_p2, %p418_p3  ;;  %p440_p5 = scmp.lt.s32.totalorder %s438_s20, %s431_s13 }
  0x25   : > { %p435_p12 = pneg %p434_p4  ;;  %p441_p8 = por %p440_p5, %p439_p11 }
  0x27   : > { %p442_p9 = pnand %p441_p8, %p435_p12 }
  0x29   : > { %445 = shalt.err (!%p442_p9)
}
  0x2a   : > { %361 = dma.hbm_to_vmem [thread:$0]  (!%p593_p13), %s589_s25, 512, %s597_s27, %s88_s29  }
  0x2b   : > { %p735_p0 = scmp.lt.s32.totalorder %s512_s9, 3  ;;  %p736_p1 = scmp.ge.s32.totalorder %s512_s9, 1 }
  0x2d   : > { %p105_p3 = pnand %p736_p1, %p735_p0 }
  0x2e   : > { %s631_s21 = sand.u32 (!%p105_p3), 1, %s504_s7  }
  0x2f   : > { %108 = sbr.rel (%p105_p3) target bundleno = 124 (0x7c), region = 24  ;;  %s337_s22 = sshll.u32 (!%p105_p3), %s631_s21, 5 }
  0x30   : > { %s111_s23 = scalar_lea.sflag (!%p105_p3), [#allocation3], %s631_s21  ;;  %s114_s24 = scalar_lea.vmem (!%p105_p3), [#allocation2], %s337_s22 }
  0x36   : > { %491 = dma.done.wait (%p569_p6), %s111_s23, 512  }
  0x37   : > { %493 = vsyncadd (%p569_p6), %s111_s23, 4294966784  ;;  %v641_v0 = vld [vmem:[%s114_s24] sm:$0xff]  ;;  %v643_v1 = vld [vmem:[%s114_s24 + $0x8] sm:$0xff]  ;;  %s132_s17 = scalar_lea.vmem [#allocation5], %s337_s22  ;;  %s353_s26 = sshll.u32 %s547_s10, 9 }
  0x38   : > { %v645_v2 = vld [vmem:[%s114_s24 + $0x10] sm:$0xff]  ;;  %v648_v3 = vand.u32 2147483647, %v641_v0  ;;  %v651_v4 = vand.u32 2147483647, %v643_v1  ;;  %v656_v6 = vld [vmem:[%s114_s24 + $0x18] sm:$0xff]  ;;  %s685_s29 = scalar_lea.hbm %s728_s1, %s353_s26 }
  0x39   : > { %v654_v5 = vand.u32 2147483647, %v645_v2  ;;  %v662_v10 = vand.u32 2147483647, %v656_v6  ;;  %s260_s25 = sshll.u32 %s132_s17, 4  ;;  %s246_s30 = scalar_lea.sflag [#allocation4], %s631_s21  ;;  %s680_s25 = int_to_ptr.vmem [resolvable:$true] %s260_s25 }
  0x3a   : > { %v141_v7 = vmul.f32 0.70710677, %v648_v3  ;;  %v142_v8 = vmul.f32 0.70710677, %v651_v4  ;;  %s446_s2 = scalar_lea.vmem %s680_s25, 512  ;;  %p737_p11 = scmp.ne.s32.totalorder %s732_s18, 0 }
  0x3b   : > { %v143_v9 = vmul.f32 0.70710677, %v654_v5  ;;  %v144_v14 = vmul.f32 0.70710677, %v662_v10  ;;  %p447_p6 = scmp.ne.s32.totalorder %s680_s25, %s446_s2  ;;  %s515_s10 = smov [#allocation5]  }
  0x3c   : > { %v145_v11 = vmul.f32 0.3275911, %v141_v7  ;;  %v146_v12 = vmul.f32 0.3275911, %v142_v8  ;;  %v205_v23 = vsub.f32 0.0, %v141_v7  ;;  %v206_v26 = vsub.f32 0.0, %v142_v8 }
  0x3d   : > { %v147_v13 = vmul.f32 0.3275911, %v143_v9  ;;  %v148_v17 = vmul.f32 0.3275911, %v144_v14  ;;  %v207_v34 = vsub.f32 0.0, %v143_v9  ;;  %v208_v40 = vsub.f32 0.0, %v144_v14  ;;  %p448_p12 = pnand %p447_p6, %p737_p11 }
  0x3e   : > { %v149_v15 = vadd.f32 1.0, %v145_v11  ;;  %v150_v16 = vadd.f32 1.0, %v146_v12  ;;  %v209_v32 = vmul.f32 %v205_v23, %v141_v7  ;;  %v210_v36 = vmul.f32 %v206_v26, %v142_v8  ;;  %s450_s3 = sshll.u32 %s515_s10, 4  ;;  %s451_s3 = int_to_ptr.vmem [resolvable:$false] %s450_s3 }
  0x3f   : > { %v151_v18 = vadd.f32 1.0, %v147_v13  ;;  %v152_v19 = vadd.f32 1.0, %v148_v17  ;;  %v211_v46 = vmul.f32 %v207_v34, %v143_v9  ;;  %v212_v52 = vmul.f32 %v208_v40, %v144_v14  ;;  %p449_p13 = pneg %p448_p12  ;;  %s452_s4 = scalar_lea.vmem %s451_s3, 1024 }
  0x40   : > { %400 = vrcp.f32 %v149_v15  ;;  %v213_v44 = vmul.f32 1.442695, %v209_v32  ;;  %v215_v48 = vmul.f32 1.442695, %v210_v36  ;;  %p453_p7 = scmp.lt.s32.totalorder %s680_s25, %s451_s3  ;;  %p454_p10 = scmp.lt.s32.totalorder %s452_s4, %s446_s2 }
  0x41   : > { %402 = vrcp.f32 %v150_v16  ;;  %v217_v57 = vmul.f32 1.442695, %v211_v46  ;;  %v219_v62 = vmul.f32 1.442695, %v212_v52 }
  0x42   : > { %404 = vrcp.f32 %v151_v18  ;;  %p455_p2 = por %p454_p10, %p453_p7 }
  0x43   : > { %406 = vrcp.f32 %v152_v19 }
  0x44   : > { %408 = vpow2.f32 %v213_v44  ;;  %p456_p4 = pnand %p455_p2, %p449_p13 }
  0x45   : > { %410 = vpow2.f32 %v215_v48 }
  0x46   : > { %412 = vpow2.f32 %v217_v57 }
  0x47   : > { %414 = vpow2.f32 %v219_v62 }
  0x4a   : > { %v401_v20 = vpop.eup %400 }
  0x4b   : > { %v403_v21 = vpop.eup %402  ;;  %v157_v22 = vmul.f32 %v401_v20, %v149_v15 }
  0x4c   : > { %v158_v24 = vmul.f32 %v403_v21, %v150_v16  ;;  %v405_v27 = vpop.eup %404 }
  0x4d   : > { %v161_v25 = vsub.f32 2.0, %v157_v22  ;;  %v159_v30 = vmul.f32 %v405_v27, %v151_v18  ;;  %v407_v31 = vpop.eup %406 }
  0x4e   : > { %v162_v28 = vsub.f32 2.0, %v158_v24  ;;  %v160_v38 = vmul.f32 %v407_v31, %v152_v19  ;;  %v409_v22 = vpop.eup %408 }
  0x4f   : > { %v165_v29 = vmul.f32 %v401_v20, %v161_v25  ;;  %v163_v37 = vsub.f32 2.0, %v159_v30  ;;  %v411_v24 = vpop.eup %410  ;;  %v221_v25 = vadd.f32 %v648_v3, %v641_v0  ;;  %v222_v30 = vadd.f32 %v651_v4, %v643_v1 }
  0x50   : > { %v166_v33 = vmul.f32 %v403_v21, %v162_v28  ;;  %v164_v43 = vsub.f32 2.0, %v160_v38 }
  0x51   : > { %v169_v35 = vmul.f32 1.0614054, %v165_v29  ;;  %v167_v42 = vmul.f32 %v405_v27, %v163_v37  ;;  %v223_v37 = vadd.f32 %v654_v5, %v645_v2 }
  0x52   : > { %v170_v39 = vmul.f32 1.0614054, %v166_v33  ;;  %v168_v50 = vmul.f32 %v407_v31, %v164_v43 }
  0x53   : > { %v339_v41 = vadd.f32 -1.4531521, %v169_v35  ;;  %v171_v49 = vmul.f32 1.0614054, %v167_v42  ;;  %v413_v35 = vpop.eup %412 }
  0x54   : > { %v340_v45 = vadd.f32 -1.4531521, %v170_v39  ;;  %v172_v55 = vmul.f32 1.0614054, %v168_v50  ;;  %v415_v38 = vpop.eup %414 }
  0x55   : > { %v177_v47 = vmul.f32 %v339_v41, %v165_v29  ;;  %v341_v54 = vadd.f32 -1.4531521, %v171_v49 }
  0x56   : > { %v178_v51 = vmul.f32 %v340_v45, %v166_v33  ;;  %v342_v60 = vadd.f32 -1.4531521, %v172_v55 }
  0x57   : > { %v181_v53 = vadd.f32 1.4214138, %v177_v47  ;;  %v179_v59 = vmul.f32 %v341_v54, %v167_v42 }
  0x58   : > { %v182_v56 = vadd.f32 1.4214138, %v178_v51  ;;  %v180_v8 = vmul.f32 %v342_v60, %v168_v50 }
  0x59   : > { %v185_v58 = vmul.f32 %v181_v53, %v165_v29  ;;  %v183_v7 = vadd.f32 1.4214138, %v179_v59 }
  0x5a   : > { %v186_v61 = vmul.f32 %v182_v56, %v166_v33  ;;  %v184_v13 = vadd.f32 1.4214138, %v180_v8 }
  0x5b   : > { %v343_v63 = vadd.f32 -0.28449672, %v185_v58  ;;  %v187_v12 = vmul.f32 %v183_v7, %v167_v42 }
  0x5c   : > { %v344_v9 = vadd.f32 -0.28449672, %v186_v61  ;;  %v188_v17 = vmul.f32 %v184_v13, %v168_v50 }
  0x5d   : > { %v193_v11 = vmul.f32 %v343_v63, %v165_v29  ;;  %v345_v16 = vadd.f32 -0.28449672, %v187_v12 }
  0x5e   : > { %v194_v14 = vmul.f32 %v344_v9, %v166_v33  ;;  %v346_v21 = vadd.f32 -0.28449672, %v188_v17 }
  0x5f   : > { %v197_v15 = vadd.f32 0.2548296, %v193_v11  ;;  %v195_v20 = vmul.f32 %v345_v16, %v167_v42 }
  0x60   : > { %v198_v18 = vadd.f32 0.2548296, %v194_v14  ;;  %v196_v28 = vmul.f32 %v346_v21, %v168_v50 }
  0x61   : > { %v201_v19 = vmul.f32 %v197_v15, %v165_v29  ;;  %v199_v27 = vadd.f32 0.2548296, %v195_v20 }
  0x62   : > { %v202_v23 = vmul.f32 %v198_v18, %v166_v33  ;;  %v200_v34 = vadd.f32 0.2548296, %v196_v28 }
  0x63   : > { %v225_v26 = vmul.f32 %v201_v19, %v648_v3  ;;  %v203_v29 = vmul.f32 %v199_v27, %v167_v42 }
  0x64   : > { %v226_v31 = vmul.f32 %v202_v23, %v651_v4  ;;  %v204_v3 = vmul.f32 %v200_v34, %v168_v50  ;;  %v224_v4 = vadd.f32 %v662_v10, %v656_v6 }
  0x65   : > { %v229_v32 = vmul.f32 %v409_v22, %v225_v26  ;;  %v227_v0 = vmul.f32 %v203_v29, %v654_v5 }
  0x66   : > { %v230_v36 = vmul.f32 %v411_v24, %v226_v31  ;;  %v228_v41 = vmul.f32 %v204_v3, %v662_v10 }
  0x67   : > { %v233_v33 = vsub.f32 %v221_v25, %v229_v32  ;;  %v231_v1 = vmul.f32 %v413_v35, %v227_v0 }
  0x68   : > { %v234_v39 = vsub.f32 %v222_v30, %v230_v36  ;;  %v232_v43 = vmul.f32 %v415_v38, %v228_v41 }
  0x69   : > { %v237_v40 = vmul.f32 0.5, %v233_v33  ;;  %v235_v2 = vsub.f32 %v223_v37, %v231_v1 }
  0x6a   : > { %v238_v42 = vmul.f32 0.5, %v234_v39  ;;  %v236_v44 = vsub.f32 %v224_v4, %v232_v43 }
  0x6b   : > { %241 = vst [vmem:[%s132_s17] sm:$0xff] %v237_v40  ;;  %v239_v5 = vmul.f32 0.5, %v235_v2 }
  0x6c   : > { %242 = vst [vmem:[%s132_s17 + $0x8] sm:$0xff] %v238_v42  ;;  %v240_v6 = vmul.f32 0.5, %v236_v44 }
  0x6d   : > { %243 = vst [vmem:[%s132_s17 + $0x10] sm:$0xff] %v239_v5 }
  0x6e   : > { %244 = vst [vmem:[%s132_s17 + $0x18] sm:$0xff] %v240_v6 }
  0x6f   : > { %459 = shalt.err (!%p456_p4)
}
  0x70   : > { %s460_s5 = scalar_lea.hbm %s685_s29, 512  ;;  %s464_s14 = scalar_lea.hbm %s728_s1, 1024 }
  0x71   : > { %p461_p5 = scmp.ne.s32.totalorder %s685_s29, %s460_s5  ;;  %p465_p0 = scmp.lt.u32.totalorder %s685_s29, %s728_s1 }
  0x72   : > { %p466_p1 = scmp.lt.u32.totalorder %s464_s14, %s460_s5  ;;  %p468_p6 = scmp.lt.u32.totalorder %s460_s5, %s685_s29 }
  0x73   : > { %p462_p8 = pnand %p461_p5, %p737_p11 }
  0x74   : > { %p467_p3 = por %p466_p1, %p465_p0 }
  0x75   : > { %p463_p9 = pneg %p462_p8 }
  0x76   : > { %p469_p12 = por %p468_p6, %p467_p3 }
  0x78   : > { %p470_p13 = pnand %p469_p12, %p463_p9 }
  0x7a   : > { %473 = shalt.err (!%p470_p13)
}
  0x7b   : > { %356 = dma.vmem_to_hbm [thread:$0]  (%p737_p11), %s680_s25, 512, %s685_s29, %s246_s30  }
  0x7c PF: > { %s272_s21 = sand.u32 1, %s500_s6   ;;  %p738_p7 = scmp.ne.s32.totalorder %s733_s19, 0 }
  0x7d   : > { %p739_p10 = scmp.ge.s32.totalorder %s512_s9, 2  ;;  %s273_s22 = scalar_lea.sflag [#allocation4], %s272_s21 }
  0x7f   : > { %p363_p2 = pnand %p739_p10, %p738_p7 }
  0x81   : > { %495 = dma.done.wait (!%p363_p2), %s273_s22, 512  }
  0x82   : > { %497 = vsyncadd (!%p363_p2), %s273_s22, 4294966784  ;;  %p14_p4 = scmp.ge.s32.totalorder %s551_s12, 4   ;;  %s740_s6 = smov %s504_s7 }
  0x83   : > { %s741_s7 = smov %s508_s8  ;;  %s742_s8 = smov %s563_s15 }
  0x84   : > { %s743_s9 = smov %s551_s12  ;;  %16 = sbr.rel (!%p14_p4) target bundleno = 5 (0x5), region = 69 }
  0x8b   :  { %278 = vsyncpa [#allocation3], 1 }
  0x8c   :  { %280 = vsyncpa [#allocation3 + $0x1], 1 }
  0x8d   :  { %281 = vsyncpa [#allocation4], 1 }
  0x8e   :  { %283 = vsyncpa [#allocation4 + $0x1], 1 }

</bundles_post_ra>
